<compile_context>
chip_gen: v5e
topology: v5e:2x2
jax: 0.10.0
libtpu: 0.0.40
codegen_flags: <defaults>
</compile_context>

<pallas_src>
import functools

import jax
import jax.numpy as jnp
from jax.experimental import pallas as pl
from jax.experimental.pallas import tpu as pltpu

_MIB = 1 << 20


def _exp_utility_risk_kernel(
    atom_ref,      # (1, A)   f32
    scal_ref,      # (TB, 3)  f32   columns = [cost | not_done | threshold]
    curr_p_ref,    # (TB, A)  native dtype (f32 or bf16)
    next_p_ref,    # (TB, A)  native dtype
    out_ref,       # (1, TB)  f32   lane-dense output slab
    *,
    discount_factor: float,
    temperature: float,
    max_atom_value: float,
):
    f32 = jnp.float32
    t = temperature
    inv_t = 1.0 / temperature
    eps = 1e-8

    # Hoisted per-block constants (shared by both utility branches).
    atoms = atom_ref[...].astype(f32)            # (1, A)
    t_atoms = t * atoms                          # temperature * atom_values
    df_t_atoms = discount_factor * t_atoms       # discount * temperature * atoms

    scal = scal_ref[...].astype(f32)             # (TB, 3)
    cost = scal[:, 0:1]                          # (TB, 1)
    not_done = scal[:, 1:2]                      # (TB, 1)
    thr = jnp.maximum(scal[:, 2:3], 0.0)         # clamp(min=0)
    t_thr = t * thr                              # (TB, 1)

    def weighted_exp_sum(x, p_ref):
        # clamp(max=max_atom_value) AFTER the temperature multiply (matches
        # the PyTorch module), then exp (EUP), weight by probs, row-reduce.
        e = jnp.exp(jnp.minimum(x, max_atom_value))       # (TB, A)
        p = p_ref[...].astype(f32)                        # in-kernel cast
        return jnp.sum(p * e, axis=1, keepdims=True)      # (TB, 1) XLU reduce

    # curr branch first, then next: keeps at most a handful of (TB, A) f32
    # temporaries live at once (counted in the block-size budget).
    s_curr = weighted_exp_sum(t_atoms - t_thr, curr_p_ref)
    s_next = weighted_exp_sum((t * cost - t_thr) + not_done * df_t_atoms,
                              next_p_ref)

    res = (jnp.log(s_next + eps) - jnp.log(s_curr + eps)) * inv_t   # (TB, 1)
    # Lane-dense store: pivot the per-row column into lanes (tiny XLU vxpose,
    # XLU is otherwise only doing the row reductions), so the output write is
    # a contiguous (1, TB) slab instead of TB masked width-1 stores.
    out_ref[...] = jnp.transpose(res).astype(out_ref.dtype)


def _round_down(x, m):
    return (x // m) * m


def _round_up(x, m):
    return -((-x) // m) * m


def _vmem_capacity_bytes() -> int:
    try:
        return int(pltpu.get_tpu_info().vmem_capacity_bytes)
    except Exception:
        return 64 * _MIB        # conservative (v7x-sized) fallback


def _plan_blocks(bs, num_atoms, prob_itemsize, block_rows=None):
    """Pick (tb, prob_buffer_count, vmem_limit_bytes) per TPU generation."""
    vmem_cap = _vmem_capacity_bytes()
    big_vmem = vmem_cap >= 100 * _MIB                 # v5e / v6e: 128 MiB physical
    prob_buffers = 3 if (big_vmem and hasattr(pl, "Buffered")) else 2

    # Total on-chip working-set target (pipeline buffers + in-kernel temps).
    working_set = (44 * _MIB) if big_vmem else (36 * _MIB)
    vmem_limit = int(min(vmem_cap - 8 * _MIB, working_set + 18 * _MIB))

    a_pad = max(_round_up(num_atoms, 128), 128)
    # Per-batch-row VMEM cost:
    #   two prob streams, `prob_buffers`-deep buffers -> prob_buffers*2*a_pad*isz
    #   packed scalars (tb, 3) lane-pad to 128 lanes, 2 buffers -> 2 * 128 * 4
    #   lane-dense out (1, tb) sublane-pad to 8, 2 buffers      -> 2 *   8 * 4
    #   ~6 live (tb, A) f32 temporaries inside the kernel       -> 6 * a_pad * 4
    bytes_per_row = (prob_buffers * 2 * a_pad * prob_itemsize
                     + 2 * 128 * 4 + 2 * 8 * 4 + 6 * a_pad * 4)
    tb_vmem = working_set // bytes_per_row

    # Keep >= ~4 grid steps so both v7x TensorCores get work and the pipeline
    # has something to overlap; large blocks still amortize per-step overhead.
    tb_parallel = _round_up(max(pl.cdiv(bs, 4), 1), 128)

    tb = min(tb_vmem, tb_parallel) if block_rows is None else int(block_rows)
    # Lane-dense (1, tb) output block => tb must be a multiple of 128, unless
    # a single block covers the whole batch (block == full extents).
    tb = max(128, _round_down(tb, 128))
    if tb >= bs:
        tb = bs
    return int(tb), prob_buffers, vmem_limit


class ExpUtilityRisk:
    """JAX / Pallas-TPU implementation of the PyTorch ExpUtilityRisk module."""

    def __init__(self, discount_factor, temperature, max_atom_value):
        assert 0 <= discount_factor <= 1
        assert temperature > 0
        self.discount_factor = float(discount_factor)
        self.temperature = float(temperature)
        self.max_atom_value = float(max_atom_value)

    def __call__(self, atom_values, curr_atom_probs, next_atom_probs,
                 cost, not_done, threshold, curr_return, *, block_rows=None):
        bs, num_atoms = curr_atom_probs.shape
        assert atom_values.shape == (num_atoms,)
        assert next_atom_probs.shape == (bs, num_atoms)
        assert cost.shape == (bs, 1)
        assert not_done.shape == (bs, 1)
        assert threshold.shape == (bs, 1)
        assert curr_return.shape == (bs, 1)   # validated but unused, as in reference

        f32 = jnp.float32
        atoms_2d = jnp.asarray(atom_values, f32).reshape(1, num_atoms)

        # Pack the three (bs, 1) per-row scalars into one (bs, 3) array:
        # one DMA / one VMEM tile per block instead of three.
        scalars = jnp.concatenate(
            [jnp.asarray(cost, f32),
             jnp.asarray(not_done, f32),
             jnp.asarray(threshold, f32)], axis=1)          # (bs, 3)

        prob_itemsize = jnp.dtype(curr_atom_probs.dtype).itemsize
        tb, prob_buffers, vmem_limit = _plan_blocks(
            bs, num_atoms, prob_itemsize, block_rows=block_rows)
        num_blocks = pl.cdiv(bs, tb)
        grid = (num_blocks,)
        if prob_buffers != 2 and num_blocks < 4:
            prob_buffers = 2          # deep buffering pointless on short grids

        prob_spec_kwargs = {}
        if prob_buffers != 2:
            prob_spec_kwargs["pipeline_mode"] = pl.Buffered(prob_buffers)

        kernel = functools.partial(
            _exp_utility_risk_kernel,
            discount_factor=self.discount_factor,
            temperature=self.temperature,
            max_atom_value=self.max_atom_value,
        )

        out_row = pl.pallas_call(
            kernel,
            out_shape=jax.ShapeDtypeStruct((1, bs), f32),
            grid=grid,
            in_specs=[
                pl.BlockSpec((1, num_atoms), lambda i: (0, 0)),   # atom values
                pl.BlockSpec((tb, 3), lambda i: (i, 0)),          # packed scalars
                pl.BlockSpec((tb, num_atoms), lambda i: (i, 0),
                             **prob_spec_kwargs),                 # curr probs
                pl.BlockSpec((tb, num_atoms), lambda i: (i, 0),
                             **prob_spec_kwargs),                 # next probs
            ],
            out_specs=pl.BlockSpec((1, tb), lambda i: (0, i)),    # lane-dense
            compiler_params=pltpu.CompilerParams(
                dimension_semantics=("parallel",),                # megacore split
                vmem_limit_bytes=vmem_limit),
        )(atoms_2d, scalars, curr_atom_probs, next_atom_probs)
        return out_row.reshape(bs, 1)


def _reference_jax(module, atom_values, curr_atom_probs, next_atom_probs,
                   cost, not_done, threshold, curr_return):
    """Pure-JAX reference mirroring the PyTorch forward."""
    thr = jnp.maximum(threshold.astype(jnp.float32), 0.0)
    atoms = atom_values.astype(jnp.float32)[None, :]
    curr_av = atoms - thr
    next_av = (cost.astype(jnp.float32)
               + module.discount_factor * not_done.astype(jnp.float32) * atoms
               - thr)

    def util(av, probs):
        x = jnp.minimum(module.temperature * av, module.max_atom_value)
        x = jnp.exp(x)
        s = jnp.sum(probs.astype(jnp.float32) * x, axis=1, keepdims=True)
        return jnp.log(s + 1e-8) / module.temperature

    return util(next_av, next_atom_probs) - util(curr_av, curr_atom_probs)


def _make_inputs(key, bs, num_atoms):
    k1, k2, k3, k4, k5, k6 = jax.random.split(key, 6)
    atom_values = jnp.linspace(-5.0, 5.0, num_atoms, dtype=jnp.float32)
    curr_atom_probs = jax.nn.softmax(
        jax.random.normal(k1, (bs, num_atoms), dtype=jnp.float32), axis=1)
    next_atom_probs = jax.nn.softmax(
        jax.random.normal(k2, (bs, num_atoms), dtype=jnp.float32), axis=1)
    cost = jax.random.uniform(k3, (bs, 1), dtype=jnp.float32)
    not_done = (jax.random.uniform(k4, (bs, 1)) > 0.2).astype(jnp.float32)
    threshold = jax.random.normal(k5, (bs, 1), dtype=jnp.float32)
    curr_return = jax.random.normal(k6, (bs, 1), dtype=jnp.float32)
    return (atom_values, curr_atom_probs, next_atom_probs,
            cost, not_done, threshold, curr_return)


if __name__ == "__main__":
    module = ExpUtilityRisk(discount_factor=0.99, temperature=0.5,
                            max_atom_value=10.0)
    key = jax.random.PRNGKey(0)
    k_a, k_b, k_c = jax.random.split(key, 3)

    # 1) Small single-block path (grid = 1, every block == full extents).
    args = _make_inputs(k_a, bs=24, num_atoms=32)
    out = jax.block_until_ready(module(*args))
    ref = _reference_jax(module, *args)
    assert out.shape == (24, 1)
    assert jnp.allclose(out, ref, atol=1e-5, rtol=1e-5), "single-block mismatch"

    # 2) Tiled lane-dense path (grid = 4): pipelined "parallel" batch grid,
    #    and (on 128-MiB-VMEM parts) the 3-deep prob-stream buffering.
    args = _make_inputs(k_b, bs=1024, num_atoms=128)
    out = jax.block_until_ready(module(*args, block_rows=256))
    ref = _reference_jax(module, *args)
    assert out.shape == (1024, 1)
    assert jnp.allclose(out, ref, atol=1e-5, rtol=1e-5), "tiled mismatch"

    # 3) Ragged batch (grid = 3, partial 88-row edge block masked on writeback).
    args = _make_inputs(k_c, bs=600, num_atoms=64)
    out = jax.block_until_ready(module(*args, block_rows=256))
    ref = _reference_jax(module, *args)
    assert out.shape == (600, 1)
    assert jnp.allclose(out, ref, atol=1e-5, rtol=1e-5), "ragged mismatch"

    print("KERNEL_OK")
</pallas_src>

<mosaic_0001>
module attributes {stable_mosaic.version = 11 : i64} {
  func.func @_exp_utility_risk_kernel(%arg0: i32, %arg1: memref<1x32xf32, #tpu.memory_space<vmem>>, %arg2: memref<24x3xf32, #tpu.memory_space<vmem>>, %arg3: memref<24x32xf32, #tpu.memory_space<vmem>>, %arg4: memref<24x32xf32, #tpu.memory_space<vmem>>, %arg5: memref<1x24xf32, #tpu.memory_space<vmem>>) attributes {dimension_semantics = [#tpu.dimension_semantics<parallel>], iteration_bounds = array<i64: 1>, scalar_prefetch = 0 : i64, scratch_operands = 0 : i64, tpu.core_type = #tpu.core_type<tc>, window_params = [{pipeline_mode = #tpu.pipeline_mode<synchronous>, transform_indices = @transform_0, window_bounds = array<i64: 1, 32>}, {transform_indices = @transform_1, window_bounds = array<i64: 24, 3>}, {transform_indices = @transform_2, window_bounds = array<i64: 24, 32>}, {transform_indices = @transform_3, window_bounds = array<i64: 24, 32>}, {transform_indices = @transform_4, window_bounds = array<i64: 1, 24>}]} {
    %c0 = arith.constant 0 : index
    %c0_0 = arith.constant 0 : index
    %0 = vector.load %arg1[%c0, %c0_0] : memref<1x32xf32, #tpu.memory_space<vmem>>, vector<1x32xf32>
    %cst = arith.constant 5.000000e-01 : f32
    %1 = vector.broadcast %cst : f32 to vector<1x32xf32>
    %2 = arith.mulf %1, %0 : vector<1x32xf32>
    %cst_1 = arith.constant 9.900000e-01 : f32
    %3 = vector.broadcast %cst_1 : f32 to vector<1x32xf32>
    %4 = arith.mulf %3, %2 : vector<1x32xf32>
    %c0_2 = arith.constant 0 : index
    %c0_3 = arith.constant 0 : index
    %5 = vector.load %arg2[%c0_2, %c0_3] : memref<24x3xf32, #tpu.memory_space<vmem>>, vector<24x3xf32>
    %6 = vector.extract_strided_slice %5 {offsets = [0, 0], sizes = [24, 1], strides = [1, 1]} : vector<24x3xf32> to vector<24x1xf32>
    %7 = vector.extract_strided_slice %5 {offsets = [0, 1], sizes = [24, 1], strides = [1, 1]} : vector<24x3xf32> to vector<24x1xf32>
    %8 = vector.extract_strided_slice %5 {offsets = [0, 2], sizes = [24, 1], strides = [1, 1]} : vector<24x3xf32> to vector<24x1xf32>
    %cst_4 = arith.constant 0.000000e+00 : f32
    %9 = vector.broadcast %cst_4 : f32 to vector<24x1xf32>
    %10 = arith.maximumf %8, %9 : vector<24x1xf32>
    %cst_5 = arith.constant 5.000000e-01 : f32
    %11 = vector.broadcast %cst_5 : f32 to vector<24x1xf32>
    %12 = arith.mulf %11, %10 : vector<24x1xf32>
    %13 = vector.broadcast %2 : vector<1x32xf32> to vector<24x32xf32>
    %14 = vector.broadcast %12 : vector<24x1xf32> to vector<24x32xf32>
    %15 = arith.subf %13, %14 : vector<24x32xf32>
    %cst_6 = arith.constant 1.000000e+01 : f32
    %16 = vector.broadcast %cst_6 : f32 to vector<24x32xf32>
    %17 = arith.minimumf %15, %16 : vector<24x32xf32>
    %18 = math.exp %17 : vector<24x32xf32>
    %c0_7 = arith.constant 0 : index
    %c0_8 = arith.constant 0 : index
    %19 = vector.load %arg3[%c0_7, %c0_8] : memref<24x32xf32, #tpu.memory_space<vmem>>, vector<24x32xf32>
    %20 = arith.mulf %19, %18 : vector<24x32xf32>
    %cst_9 = arith.constant dense<0.000000e+00> : vector<24xf32>
    %21 = vector.multi_reduction <add>, %20, %cst_9 [1] : vector<24x32xf32> to vector<24xf32>
    %22 = vector.shape_cast %21 : vector<24xf32> to vector<24x1xf32>
    %cst_10 = arith.constant 5.000000e-01 : f32
    %23 = vector.broadcast %cst_10 : f32 to vector<24x1xf32>
    %24 = arith.mulf %23, %6 : vector<24x1xf32>
    %25 = arith.subf %24, %12 : vector<24x1xf32>
    %26 = vector.broadcast %7 : vector<24x1xf32> to vector<24x32xf32>
    %27 = vector.broadcast %4 : vector<1x32xf32> to vector<24x32xf32>
    %28 = arith.mulf %26, %27 : vector<24x32xf32>
    %29 = vector.broadcast %25 : vector<24x1xf32> to vector<24x32xf32>
    %30 = arith.addf %29, %28 : vector<24x32xf32>
    %cst_11 = arith.constant 1.000000e+01 : f32
    %31 = vector.broadcast %cst_11 : f32 to vector<24x32xf32>
    %32 = arith.minimumf %30, %31 : vector<24x32xf32>
    %33 = math.exp %32 : vector<24x32xf32>
    %c0_12 = arith.constant 0 : index
    %c0_13 = arith.constant 0 : index
    %34 = vector.load %arg4[%c0_12, %c0_13] : memref<24x32xf32, #tpu.memory_space<vmem>>, vector<24x32xf32>
    %35 = arith.mulf %34, %33 : vector<24x32xf32>
    %cst_14 = arith.constant dense<0.000000e+00> : vector<24xf32>
    %36 = vector.multi_reduction <add>, %35, %cst_14 [1] : vector<24x32xf32> to vector<24xf32>
    %37 = vector.shape_cast %36 : vector<24xf32> to vector<24x1xf32>
    %cst_15 = arith.constant 9.99999993E-9 : f32
    %38 = vector.broadcast %cst_15 : f32 to vector<24x1xf32>
    %39 = arith.addf %37, %38 : vector<24x1xf32>
    %40 = math.log %39 : vector<24x1xf32>
    %cst_16 = arith.constant 9.99999993E-9 : f32
    %41 = vector.broadcast %cst_16 : f32 to vector<24x1xf32>
    %42 = arith.addf %22, %41 : vector<24x1xf32>
    %43 = math.log %42 : vector<24x1xf32>
    %44 = arith.subf %40, %43 : vector<24x1xf32>
    %cst_17 = arith.constant 2.000000e+00 : f32
    %45 = vector.broadcast %cst_17 : f32 to vector<24x1xf32>
    %46 = arith.mulf %44, %45 : vector<24x1xf32>
    %47 = tpu.transpose %46, [1, 0] : vector<24x1xf32> -> vector<1x24xf32>
    %c0_18 = arith.constant 0 : index
    %c0_19 = arith.constant 0 : index
    %48 = vector.load %arg5[%c0_18, %c0_19] : memref<1x24xf32, #tpu.memory_space<vmem>>, vector<1x24xf32>
    tpu.vector_store %arg5[%c0_18, %c0_19], %47 {strides = array<i32>} : memref<1x24xf32, #tpu.memory_space<vmem>>, vector<1x24xf32>,
    return
  }
  func.func @transform_0(%arg0: i32) -> (i32, i32) {
    %c0_i32 = arith.constant 0 : i32
    %c0_i32_0 = arith.constant 0 : i32
    %c0_i32_1 = arith.constant 0 : i32
    return %c0_i32, %c0_i32_0 : i32, i32
  }
  func.func @transform_1(%arg0: i32) -> (i32, i32) {
    %c0_i32 = arith.constant 0 : i32
    %c0_i32_0 = arith.constant 0 : i32
    return %arg0, %c0_i32 : i32, i32
  }
  func.func @transform_2(%arg0: i32) -> (i32, i32) {
    %c0_i32 = arith.constant 0 : i32
    %c0_i32_0 = arith.constant 0 : i32
    return %arg0, %c0_i32 : i32, i32
  }
  func.func @transform_3(%arg0: i32) -> (i32, i32) {
    %c0_i32 = arith.constant 0 : i32
    %c0_i32_0 = arith.constant 0 : i32
    return %arg0, %c0_i32 : i32, i32
  }
  func.func @transform_4(%arg0: i32) -> (i32, i32) {
    %c0_i32 = arith.constant 0 : i32
    %c0_i32_0 = arith.constant 0 : i32
    return %c0_i32, %arg0 : i32, i32
  }
}

</mosaic_0001>

<bundles_post_ra>
// kernel: tpu_custom_call.1
= control target key start
LH: loop header
LB: loop body
LE: loop exit
PB: predicated region body
PF: predicated region fallthrough
CT: control target
= control target key end

     0   :  { %9 = vsyncpa [#allocation3], 0  ;;  %s404_s0 = inlined_call_operand.vmem [shape: f32[1,32], index: 0, kind: input, shape index: {}]   ;;  %s405_s1 = inlined_call_operand.vmem [shape: f32[24,3], index: 1, kind: input, shape index: {}]   ;;  %s406_s2 = inlined_call_operand.vmem [shape: f32[24,32], index: 2, kind: input, shape index: {}]   ;;  %s407_s3 = inlined_call_operand.hbm [shape: f32[24,32], index: 3, kind: input, shape index: {}]   ;;  %s408_s4 = inlined_call_operand.hbm [shape: f32[1,24], index: 4, kind: output, shape index: {}]  }
   0x1   :  { %10 = vsyncpa [#allocation4], 0  ;;  %s21_s17 = sshll.u32 %s407_s3, 4  ;;  %s338_s18 = smov [#allocation2]   ;;  %s22_s17 = int_to_ptr.hbm [resolvable:$true] %s21_s17 }
   0x2   :  { %s23_s19 = sshll.u32 %s338_s18, 4  ;;  %s339_s20 = smov 128   ;;  %s24_s19 = int_to_ptr.vmem [resolvable:$true] %s23_s19 }
   0x3   :  { %s340_s21 = smov 8  }
   0x4   :  { %29 = dma.hbm_to_vmem [thread:$0]  %s22_s17, 384, %s24_s19, [#allocation3], %s339_s20, %s339_s20, %s340_s21  }
   0x5   :  { %334 = dma.done.wait [#allocation3], 384  }
   0x6   :  { %335 = vsyncadd [#allocation3], 4294966912  ;;  %v341_v0 = vmov 1   ;;  %v342_v1 = vmov 2   ;;  %v39_v2 = vld [vmem:[%s405_s1 + $0x10] sm:$0xff]  ;;  %v37_v3 = vld [vmem:[%s405_s1] sm:$0xff] }
   0x7   :  { %254 = vset.pattern.permute.xlu1 %v341_v0  ;;  %255 = vset.pattern.permute.xlu0 %v341_v0  ;;  %v42_v4 = vmax.f32 %v39_v2, 0.0  ;;  %v40_v5 = vmax.f32 %v37_v3, 0.0  ;;  %v38_v6 = vld [vmem:[%s405_s1 + $0x8] sm:$0xff]  ;;  %s343_s27 = smov 126   ;;  %v344_v11 = vmov 0   ;;  %v94_v12 = vmul.f32 0.5, %v39_v2 }
   0x8   :  { %256 = vset.pattern.permute.xlu2 %v342_v1  ;;  %v41_v9 = vmax.f32 %v38_v6, 0.0  ;;  %v92_v13 = vmul.f32 0.5, %v37_v3  ;;  %v93_v18 = vmul.f32 0.5, %v38_v6  ;;  %v34_v21 = vld [vmem:[%s404_s0] sm:$0x1]  ;;  %vm82_vm0 = vcmask 261120  }
   0x9   :  { %v45_v7 = vmul.f32 0.5, %v42_v4  ;;  %v43_v8 = vmul.f32 0.5, %v40_v5  ;;  %v35_v22 = vmul.f32 0.5, %v34_v21  ;;  %v76_v33 = vld [vmem:[%s406_s2] sm:$0xff]  ;;  %v77_v39 = vld [vmem:[%s406_s2 + $0x8] sm:$0xff]  ;;  %s235_s11 = sshll.u32 %s408_s4, 4  ;;  %s236_s11 = int_to_ptr.hbm [resolvable:$true] %s235_s11 }
   0xa   :  { %v44_v10 = vmul.f32 0.5, %v41_v9  ;;  %v155_v53 = vld [vmem:[#allocation2] sm:$0xff]  ;;  %v156_v61 = vld [vmem:[#allocation2 + $0x8] sm:$0xff]  ;;  %vm226_vm1 = vcmask 188416  }
   0xb   :  { %99 = vrot.lane.b32.xlu1 %v45_v7, %s343_s27  ;;  %95 = vrot.lane.b32.xlu0 %v43_v8, %s343_s27  ;;  %v47_v23 = vperm.slane %v35_v22, 0  ;;  %v36_v38 = vmul.f32 0.99, %v35_v22 }
   0xc   :  { %51 = vperm.xlu2 %256, %v43_v8  }
   0xd   :  { %v123_v42 = vperm.slane %v36_v38, 0 }
  0x13   :  { %97 = vrot.lane.b32.xlu0 %v44_v10, %s343_s27  ;;  %109 = vperm.xlu1 %254, %v37_v3  }
  0x14   :  { %259 = vset.pattern.permute.xlu2 %v344_v11 }
  0x1b   :  { %114 = vperm.xlu0 %255, %v38_v6   ;;  %257 = vset.pattern.permute.xlu1 %v342_v1 }
  0x1c   :  { %56 = vperm.xlu1 %257, %v44_v10  }
  0x23   :  { %261 = vset.pattern.permute.xlu0 %v344_v11 }
  0x24   :  { %258 = vset.pattern.permute.xlu1 %v341_v0 }
  0x25   :  { %119 = vperm.xlu1 %258, %v39_v2  }
  0x66   :  { %v52_v24 = vpop.permute.xlu2 %51 }
  0x67   :  { %v64_v25 = vsub.f32 %v47_v23, %v52_v24 }
  0x69   :  { %v67_v26 = vmin.f32 %v64_v25, 10.0 }
  0x6b   :  { %v70_v27 = vmul.f32 1.442695, %v67_v26 }
  0x6d   :  { %262 = vpow2.f32 %v70_v27 }
  0x73   :  { %v263_v31 = vpop.eup %262 }
  0x74   :  { %v79_v35 = vmul.f32 %v263_v31, %v76_v33 }
  0x76   :  { %v83_v36 = vsel %vm82_vm0, %v79_v35, 0.0 }
  0x77   :  { %84 = vadd.xlane.f32.xlu1 %v83_v36 }
  0x7d   :  { %v100_v14 = vpop.permute.xlu1 %99  ;;  %v96_v15 = vpop.permute.xlu0 %95 }
  0x7e   :  { %v106_v16 = vsub.f32 %v94_v12, %v100_v14  ;;  %v104_v17 = vsub.f32 %v92_v13, %v96_v15  ;;  %v157_v12 = vld [vmem:[#allocation2 + $0x10] sm:$0xff] }
  0x80   :  { %140 = vperm.xlu0 %261, %v106_v16   ;;  %130 = vperm.xlu2 %259, %v104_v17  }
  0x85   :  { %v98_v19 = vpop.permute.xlu0 %97  ;;  %v110_v28 = vpop.permute.xlu1 %109 }
  0x86   :  { %v105_v20 = vsub.f32 %v93_v18, %v98_v19  ;;  %v125_v43 = vmul.f32 %v123_v42, %v110_v28 }
  0x88   :  { %135 = vperm.xlu2 %259, %v105_v20  }
  0x8d   :  { %v115_v46 = vpop.permute.xlu0 %114 }
  0x8e   :  { %v57_v29 = vpop.permute.xlu1 %56  ;;  %v126_v49 = vmul.f32 %v123_v42, %v115_v46 }
  0x8f   :  { %v65_v30 = vsub.f32 %v47_v23, %v57_v29 }
  0x90   :  { %260 = vset.pattern.permute.xlu2 %v342_v1 }
  0x91   :  { %61 = vperm.xlu2 %260, %v45_v7   ;;  %v68_v32 = vmin.f32 %v65_v30, 10.0  ;;  %v78_v7 = vld [vmem:[%s406_s2 + $0x10] sm:$0xff]  ;;  %s345_s2 = smov [#allocation5]  }
  0x92   :  { %s233_s8 = sshll.u32 %s345_s2, 4  ;;  %s234_s8 = int_to_ptr.vmem [resolvable:$true] %s233_s8 }
  0x93   :  { %v72_v34 = vmul.f32 1.442695, %v68_v32 }
  0x95   :  { %264 = vpow2.f32 %v72_v34 }
  0x97   :  { %v120_v59 = vpop.permute.xlu1 %119 }
  0x98   :  { %v127_v0 = vmul.f32 %v123_v42, %v120_v59 }
  0x9b   :  { %v265_v37 = vpop.eup %264 }
  0x9c   :  { %v80_v40 = vmul.f32 %v265_v37, %v77_v39 }
  0x9e   :  { %v86_v41 = vsel %vm82_vm0, %v80_v40, 0.0 }
  0xaa   :  { %87 = vadd.xlane.f32.xlu0 %v86_v41 }
  0xda   :  { %v131_v44 = vpop.permute.xlu2 %130 }
  0xdb   :  { %v143_v45 = vadd.f32 %v131_v44, %v125_v43 }
  0xdd   :  { %v146_v47 = vmin.f32 %v143_v45, 10.0 }
  0xdf   :  { %v149_v48 = vmul.f32 1.442695, %v146_v47 }
  0xe1   :  { %266 = vpow2.f32 %v149_v48 }
  0xe2   :  { %v136_v50 = vpop.permute.xlu2 %135 }
  0xe3   :  { %v144_v51 = vadd.f32 %v136_v50, %v126_v49 }
  0xe5   :  { %v147_v52 = vmin.f32 %v144_v51, 10.0 }
  0xe7   :  { %v267_v54 = vpop.eup %266  ;;  %v151_v55 = vmul.f32 1.442695, %v147_v52 }
  0xe8   :  { %v158_v56 = vmul.f32 %v267_v54, %v155_v53 }
  0xe9   :  { %268 = vpow2.f32 %v151_v55 }
  0xea   :  { %v161_v57 = vsel %vm82_vm0, %v158_v56, 0.0  ;;  %v85_v16 = vpop.xlane.xlu1 %84 }
  0xeb   :  { %162 = vadd.xlane.f32.xlu2 %v161_v57  ;;  %v62_v58 = vpop.permute.xlu2 %61  ;;  %v179_v17 = vadd.f32 1e-08, %v85_v16 }
  0xec   :  { %v66_v60 = vsub.f32 %v47_v23, %v62_v58 }
  0xee   :  { %v69_v62 = vmin.f32 %v66_v60, 10.0 }
  0xef   :  { %v269_v63 = vpop.eup %268 }
  0xf0   :  { %v74_v1 = vmul.f32 1.442695, %v69_v62  ;;  %v159_v2 = vmul.f32 %v269_v63, %v156_v61 }
  0xf2   :  { %270 = vpow2.f32 %v74_v1  ;;  %v141_v3 = vpop.permute.xlu0 %140  ;;  %v164_v4 = vsel %vm82_vm0, %v159_v2, 0.0 }
  0xf3   :  { %v145_v5 = vadd.f32 %v141_v3, %v127_v0  ;;  %165 = vadd.xlane.f32.xlu2 %v164_v4 }
  0xf5   :  { %v148_v6 = vmin.f32 %v145_v5, 10.0 }
  0xf7   :  { %v153_v8 = vmul.f32 1.442695, %v148_v6 }
  0xf8   :  { %v271_v9 = vpop.eup %270 }
  0xf9   :  { %272 = vpow2.f32 %v153_v8  ;;  %v81_v10 = vmul.f32 %v271_v9, %v78_v7 }
  0xfa   :  { %274 = vlog2.f32 %v179_v17 }
  0xfb   :  { %v89_v11 = vsel %vm82_vm0, %v81_v10, 0.0 }
  0xfc   :  { %90 = vadd.xlane.f32.xlu1 %v89_v11 }
  0xff   :  { %v273_v13 = vpop.eup %272 }
 0x100   :  { %v160_v14 = vmul.f32 %v273_v13, %v157_v12  ;;  %v275_v22 = vpop.eup %274 }
 0x101   :  { %v183_v26 = vmul.f32 0.6931472, %v275_v22 }
 0x102   :  { %v167_v15 = vsel %vm82_vm0, %v160_v14, 0.0 }
 0x103   :  { %168 = vadd.xlane.f32.xlu2 %v167_v15 }
 0x11d   :  { %v88_v19 = vpop.xlane.xlu0 %87 }
 0x11e   :  { %v180_v21 = vadd.f32 1e-08, %v88_v19 }
 0x15e   :  { %v163_v18 = vpop.xlane.xlu2 %162 }
 0x15f   :  { %v170_v20 = vadd.f32 1e-08, %v163_v18 }
 0x161   :  { %276 = vlog2.f32 %v170_v20 }
 0x162   :  { %278 = vlog2.f32 %v180_v21 }
 0x166   :  { %v166_v23 = vpop.xlane.xlu2 %165 }
 0x167   :  { %v277_v24 = vpop.eup %276  ;;  %v171_v25 = vadd.f32 1e-08, %v166_v23 }
 0x168   :  { %v174_v27 = vmul.f32 0.6931472, %v277_v24  ;;  %v279_v29 = vpop.eup %278 }
 0x169   :  { %280 = vlog2.f32 %v171_v25  ;;  %v185_v31 = vmul.f32 0.6931472, %v279_v29 }
 0x16a   :  { %v188_v28 = vsub.f32 %v174_v27, %v183_v26 }
 0x16c   :  { %v191_v30 = vmul.f32 2.0, %v188_v28 }
 0x16e   :  { %194 = vxpose.xlu1.b32.start [1/3] (short) (narrow) %v191_v30, 8 }
 0x16f   :  { %v281_v32 = vpop.eup %280  ;;  %v91_v33 = vpop.xlane.xlu1 %90 }
 0x170   :  { %v176_v34 = vmul.f32 0.6931472, %v281_v32  ;;  %v181_v35 = vadd.f32 1e-08, %v91_v33 }
 0x172   :  { %v189_v36 = vsub.f32 %v176_v34, %v185_v31  ;;  %282 = vlog2.f32 %v181_v35 }
 0x174   :  { %v192_v37 = vmul.f32 2.0, %v189_v36 }
 0x176   :  { %195 = vxpose.xlu1.b32.cont [2/3] (short) (narrow) %v192_v37, 8  ;;  %v169_v38 = vpop.xlane.xlu2 %168 }
 0x177   :  { %v172_v39 = vadd.f32 1e-08, %v169_v38 }
 0x178   :  { %v283_v40 = vpop.eup %282 }
 0x179   :  { %284 = vlog2.f32 %v172_v39  ;;  %v187_v41 = vmul.f32 0.6931472, %v283_v40 }
 0x17f   :  { %v285_v42 = vpop.eup %284 }
 0x180   :  { %v178_v43 = vmul.f32 0.6931472, %v285_v42 }
 0x182   :  { %v190_v44 = vsub.f32 %v178_v43, %v187_v41 }
 0x184   :  { %v193_v45 = vmul.f32 2.0, %v190_v44 }
 0x186   :  { %196 = vxpose.xlu1.b32.end [3/3] (short) (narrow) %v193_v45, 8 }
 0x21a   :  { %v210_v46 = vpop.trf.xlu1 }
 0x21b   :  { %227 = vst.msk [vmem:[#allocation5] sm:$0x1] %vm226_vm1, %v210_v46 }
 0x21c   :  { %238 = dma.vmem_to_hbm [thread:$0]  %s234_s8, 16, %s236_s11, [#allocation4]  }
 0x21d   :  { %336 = dma.done.wait [#allocation4], 16  }
 0x21e   :  { %337 = vsyncadd [#allocation4], 4294967280 }
 0x21f   :  { %243 = vsyncpa [#allocation3], 1 }
 0x220   :  { %244 = vsyncpa [#allocation4], 1 }

</bundles_post_ra>
